<compile_context>
chip_gen: v6e
topology: v6e:2x2x1
jax: 0.10.0
libtpu: 0.0.40
codegen_flags: <defaults>
</compile_context>

<pallas_src>
import math

import jax
import jax.numpy as jnp
from jax.experimental import pallas as pl
from jax.experimental.pallas import tpu as pltpu


_DEFAULT_TM = 512          # >= 512 rows per tile -> near HBM roofline
_DEFAULT_TN = 512          # column tile for the (H, H) matvec kernel
_VMEM_BUDGET = 48 << 20    # keep usage comfortably under v7x's 64 MiB VMEM


# ---------------------------------------------------------------------------
# Kernels
# ---------------------------------------------------------------------------

def _matvec_kernel(s_ref, w_ref, h_ref):
    """h[:, j-tile] = summary(1, H) @ W(H, tn)   (MXU, f32 accumulate)."""
    h_ref[...] = jnp.dot(
        s_ref[...], w_ref[...], preferred_element_type=jnp.float32
    ).astype(h_ref.dtype)


def _rowsum_broadcast_kernel(x_ref, h_ref, o_ref):
    """out[i-tile] = sum(x(tm, H) * h(1, H), axis=1)  (VPU mul + XLU reduce)."""
    prod = x_ref[...] * h_ref[...]                    # promotes to f32 (h is f32)
    o_ref[...] = jnp.sum(prod, axis=1, keepdims=True).astype(o_ref.dtype)


def _bilinear_rowsum_kernel(x_ref, s_ref, w_ref, o_ref):
    """out[i-tile] = sum(x * (s @ W), axis=1) per row tile; W stays resident."""
    h = jnp.dot(s_ref[...], w_ref[...], preferred_element_type=jnp.float32)
    o_ref[...] = jnp.sum(x_ref[...] * h, axis=1, keepdims=True).astype(o_ref.dtype)


# ---------------------------------------------------------------------------
# Helpers
# ---------------------------------------------------------------------------

def _itemsize(a):
    return jnp.dtype(a.dtype).itemsize


def _mosaic_params(est_bytes):
    """Parallel N axis; raise scoped VMEM only when the tiles need it."""
    kwargs = dict(dimension_semantics=("parallel",))
    if est_bytes > (24 << 20):  # default scoped VMEM is 16-32 MiB by chip
        kwargs["vmem_limit_bytes"] = int(
            min(max(est_bytes * 5 // 4, 32 << 20), 64 << 20)
        )
    return pltpu.CompilerParams(**kwargs)


def _pick_row_tile(n, per_row_bytes, resident_bytes):
    """Largest TM <= _DEFAULT_TM whose double-buffered tiles fit the budget."""
    if n <= _DEFAULT_TM:
        return n  # single tile; block == full dim is always a legal block shape
    tm = _DEFAULT_TM
    while tm > 8 and (2 * tm * per_row_bytes + resident_bytes) > _VMEM_BUDGET:
        tm //= 2  # stays a multiple of 8 (f32 sublane requirement)
    return tm


# ---------------------------------------------------------------------------
# Forward
# ---------------------------------------------------------------------------

def discriminator_forward(x, summary, weight):
    """Pallas implementation of Discriminator.forward.

    x: (N, H); summary: (H,) or (N, H); weight: (H, H)  ->  (N,) float32
    """
    N, H = x.shape

    if summary.ndim == 1:
        # ---- h = summary @ W, computed ONCE (column-tiled over W) ----------
        tn = H if H <= _DEFAULT_TN else _DEFAULT_TN
        mv_est = 2 * H * tn * _itemsize(weight) + 2 * H * _itemsize(summary) + 2 * tn * 4
        h = pl.pallas_call(
            _matvec_kernel,
            out_shape=jax.ShapeDtypeStruct((1, H), jnp.float32),
            grid=(pl.cdiv(H, tn),),
            in_specs=[
                pl.BlockSpec((1, H), lambda j: (0, 0)),    # summary (resident)
                pl.BlockSpec((H, tn), lambda j: (0, j)),   # W column tile
            ],
            out_specs=pl.BlockSpec((1, tn), lambda j: (0, j)),
            compiler_params=_mosaic_params(mv_est),
        )(summary[None, :], weight)

        # ---- out = rowsum(x * h): pure streaming over rows of x ------------
        resident = 2 * H * 4                               # h block (f32)
        tm = _pick_row_tile(N, H * _itemsize(x), resident)
        est = 2 * tm * H * _itemsize(x) + resident + 2 * tm * 4
        out2d = pl.pallas_call(
            _rowsum_broadcast_kernel,
            out_shape=jax.ShapeDtypeStruct((N, 1), jnp.float32),
            grid=(pl.cdiv(N, tm),),
            in_specs=[
                pl.BlockSpec((tm, H), lambda i: (i, 0)),   # x row tile (pipelined)
                pl.BlockSpec((1, H), lambda i: (0, 0)),    # h (resident)
            ],
            out_specs=pl.BlockSpec((tm, 1), lambda i: (i, 0)),
            compiler_params=_mosaic_params(est),
        )(x, h)
    else:
        # ---- per-row summary: h_i = s_i @ W inside the kernel, W resident --
        # TODO(synk): for very large H where the (H, H) weight tile alone
        # exceeds VMEM (e.g. f32 H >= 4096 on v7x), add a K-axis grid over H
        # with an f32 accumulator scratch and pl.when init/finalize.
        per_row = H * (_itemsize(x) + _itemsize(summary))
        resident = H * H * _itemsize(weight)
        tm = _pick_row_tile(N, per_row, resident)
        est = 2 * tm * per_row + resident + 2 * tm * 4
        out2d = pl.pallas_call(
            _bilinear_rowsum_kernel,
            out_shape=jax.ShapeDtypeStruct((N, 1), jnp.float32),
            grid=(pl.cdiv(N, tm),),
            in_specs=[
                pl.BlockSpec((tm, H), lambda i: (i, 0)),   # x row tile
                pl.BlockSpec((tm, H), lambda i: (i, 0)),   # summary row tile
                pl.BlockSpec((H, H), lambda i: (0, 0)),    # W (resident)
            ],
            out_specs=pl.BlockSpec((tm, 1), lambda i: (i, 0)),
            compiler_params=_mosaic_params(est),
        )(x, summary, weight)

    return out2d[:, 0]


def init_discriminator_weight(key, hidden_dim, dtype=jnp.float32):
    # Mirrors torch_geometric's `uniform(size, tensor)`:
    #   bound = 1/sqrt(size); tensor.uniform_(-bound, bound)
    bound = 1.0 / math.sqrt(hidden_dim)
    return jax.random.uniform(
        key, (hidden_dim, hidden_dim), dtype=dtype, minval=-bound, maxval=bound
    )


if __name__ == "__main__":
    N, H = 8, 32  # batch (nodes) = 8, hidden_dim = 32

    key = jax.random.PRNGKey(0)
    k_w, k_x, k_s1, k_s2 = jax.random.split(key, 4)

    weight = init_discriminator_weight(k_w, H)
    x = jax.random.normal(k_x, (N, H), dtype=jnp.float32)

    # Case 1: single (H,) summary vector (typical DGI usage; no broadcast in HBM).
    summary_vec = jax.random.normal(k_s1, (H,), dtype=jnp.float32)
    out1 = jax.block_until_ready(discriminator_forward(x, summary_vec, weight))
    ref1 = jnp.sum(x * (summary_vec @ weight), axis=1)
    assert out1.shape == (N,)
    assert jnp.allclose(out1, ref1, atol=1e-4, rtol=1e-4)

    # Case 2: per-row (N, H) summary.
    summary_mat = jax.random.normal(k_s2, (N, H), dtype=jnp.float32)
    out2 = jax.block_until_ready(discriminator_forward(x, summary_mat, weight))
    ref2 = jnp.sum(x * (summary_mat @ weight), axis=1)
    assert out2.shape == (N,)
    assert jnp.allclose(out2, ref2, atol=1e-4, rtol=1e-4)

    print("KERNEL_OK")
</pallas_src>

<mosaic_0001>
module attributes {stable_mosaic.version = 11 : i64} {
  func.func @_matvec_kernel(%arg0: i32, %arg1: memref<1x32xf32, #tpu.memory_space<vmem>>, %arg2: memref<32x32xf32, #tpu.memory_space<vmem>>, %arg3: memref<1x32xf32, #tpu.memory_space<vmem>>) attributes {dimension_semantics = [#tpu.dimension_semantics<parallel>], iteration_bounds = array<i64: 1>, scalar_prefetch = 0 : i64, scratch_operands = 0 : i64, tpu.core_type = #tpu.core_type<tc>, window_params = [{pipeline_mode = #tpu.pipeline_mode<synchronous>, transform_indices = @transform_0, window_bounds = array<i64: 1, 32>}, {transform_indices = @transform_1, window_bounds = array<i64: 32, 32>}, {transform_indices = @transform_2, window_bounds = array<i64: 1, 32>}]} {
    %c0 = arith.constant 0 : index
    %c0_0 = arith.constant 0 : index
    %0 = vector.load %arg1[%c0, %c0_0] : memref<1x32xf32, #tpu.memory_space<vmem>>, vector<1x32xf32>
    %c0_1 = arith.constant 0 : index
    %c0_2 = arith.constant 0 : index
    %1 = vector.load %arg2[%c0_1, %c0_2] : memref<32x32xf32, #tpu.memory_space<vmem>>, vector<32x32xf32>
    %cst = arith.constant dense<0.000000e+00> : vector<1x32xf32>
    %2 = tpu.matmul %0, %1, %cst {dimension_numbers = #tpu.dot_dimension_numbers<[1], [0], [0], [1], [0, 0, 1, 1], [], []>} : vector<1x32xf32>, vector<32x32xf32>, vector<1x32xf32> -> vector<1x32xf32>
    %c0_3 = arith.constant 0 : index
    %c0_4 = arith.constant 0 : index
    %3 = vector.load %arg3[%c0_3, %c0_4] : memref<1x32xf32, #tpu.memory_space<vmem>>, vector<1x32xf32>
    tpu.vector_store %arg3[%c0_3, %c0_4], %2 {strides = array<i32>} : memref<1x32xf32, #tpu.memory_space<vmem>>, vector<1x32xf32>,
    return
  }
  func.func @transform_0(%arg0: i32) -> (i32, i32) {
    %c0_i32 = arith.constant 0 : i32
    %c0_i32_0 = arith.constant 0 : i32
    %c0_i32_1 = arith.constant 0 : i32
    return %c0_i32, %c0_i32_0 : i32, i32
  }
  func.func @transform_1(%arg0: i32) -> (i32, i32) {
    %c0_i32 = arith.constant 0 : i32
    %c0_i32_0 = arith.constant 0 : i32
    return %c0_i32, %arg0 : i32, i32
  }
  func.func @transform_2(%arg0: i32) -> (i32, i32) {
    %c0_i32 = arith.constant 0 : i32
    %c0_i32_0 = arith.constant 0 : i32
    return %c0_i32, %arg0 : i32, i32
  }
}

</mosaic_0001>

<bundles_post_ra>
// kernel: tpu_custom_call.1
= control target key start
LH: loop header
LB: loop body
LE: loop exit
PB: predicated region body
PF: predicated region fallthrough
CT: control target
= control target key end

     0   :  { %7 = vsyncpa [#allocation3], 0  ;;  %s256_s0 = inlined_call_operand.hbm [shape: f32[1,32], index: 0, kind: input, shape index: {}]   ;;  %s257_s1 = inlined_call_operand.hbm [shape: f32[32,32], index: 1, kind: input, shape index: {}]   ;;  %s258_s2 = inlined_call_operand.hbm [shape: f32[1,32], index: 2, kind: output, shape index: {}]  }
   0x1   :  { %8 = vsyncpa [#allocation6], 0 }
   0x2   :  { %9 = vsyncpa [#allocation4], 0  ;;  %s225_s9 = smov [#allocation2]   ;;  %s226_s11 = smov [#allocation5]  }
   0x3   :  { %s16_s10 = sshll.u32 %s225_s9, 4  ;;  %s25_s12 = sshll.u32 %s226_s11, 4  ;;  %s17_s10 = int_to_ptr.vmem [resolvable:$true] %s16_s10  ;;  %s26_s12 = int_to_ptr.vmem [resolvable:$true] %s25_s12 }
   0x4   :  { %s167_s13 = scalar_lea.vmem %s17_s10, 16  ;;  %s171_s14 = scalar_lea.vmem %s17_s10, 32 }
   0x5   :  { %p168_p0 = scmp.ne.s32.totalorder %s17_s10, %s167_s13  ;;  %p172_p1 = scmp.lt.s32.totalorder %s17_s10, %s17_s10 }
   0x6   :  { %p173_p2 = scmp.lt.s32.totalorder %s171_s14, %s167_s13 }
   0x8   :  { %p174_p3 = por %p173_p2, %p172_p1 }
   0xa   :  { %p175_p4 = pnand %p174_p3, %p168_p0 }
   0xc   :  { %178 = shalt.err (!%p175_p4)
}
   0xd   :  { %19 = dma.hbm_to_vmem [thread:$0]  %s256_s0, 16, %s17_s10, [#allocation3]  }
   0xe   :  { %s187_s17 = scalar_lea.vmem %s26_s12, 512  ;;  %p192_p6 = scmp.lt.s32.totalorder %s26_s12, %s26_s12 }
   0xf   :  { %p188_p5 = scmp.ne.s32.totalorder %s26_s12, %s187_s17  ;;  %p193_p7 = scmp.lt.s32.totalorder %s187_s17, %s187_s17 }
  0x11   :  { %p194_p8 = por %p193_p7, %p192_p6 }
  0x13   :  { %p195_p9 = pnand %p194_p8, %p188_p5 }
  0x15   :  { %198 = shalt.err (!%p195_p9)
}
  0x16   :  { %s227_s18 = smov 128   ;;  %s228_s19 = smov 8  }
  0x17   :  { %31 = dma.hbm_to_vmem [thread:$0]  %s257_s1, 512, %s26_s12, [#allocation6], %s227_s18, %s227_s18, %s228_s19  }
  0x18   :  { %219 = dma.done.wait [#allocation3], 16  }
  0x19   :  { %220 = vsyncadd [#allocation3], 4294967280 }
  0x1a   :  { %221 = dma.done.wait [#allocation6], 512  }
  0x1b   :  { %222 = vsyncadd [#allocation6], 4294966784  ;;  %v229_v0 = vmov 0.0   ;;  %vm230_vm0 = vmmov 0   ;;  %v42_v1 = vld [vmem:[#allocation5 + $0x18] sm:$0xff]  ;;  %v41_v2 = vld [vmem:[#allocation5 + $0x10] sm:$0xff] }
  0x1c   :  { %141 = vmatprep.subr.mxu0 %v229_v0  ;;  %149 = vmatprep.mubr.msk.f32.mxu0 %vm230_vm0, %v229_v0  ;;  %v40_v3 = vld [vmem:[#allocation5 + $0x8] sm:$0xff]  ;;  %v39_v4 = vld [vmem:[#allocation5] sm:$0xff]  ;;  %v38_v5 = vld [vmem:[#allocation2] sm:$0x1]  ;;  %vm43_vm1 = vcmask 261120   ;;  %s231_s0 = smov [#allocation7]  }
  0x1d   :  { %142 = vmatpush3.msra.mxu0 %v42_v1  ;;  %s125_s1 = sshll.u32 %s231_s0, 4  ;;  %vm117_vm2 = vcmask 253952   ;;  %s126_s1 = int_to_ptr.vmem [resolvable:$true] %s125_s1 }
  0x1e   :  { %143 = vmatprep.subr.mxu0 %v229_v0  ;;  %s199_s22 = scalar_lea.vmem %s126_s1, 16  ;;  %s203_s23 = scalar_lea.vmem %s126_s1, 32 }
  0x1f   :  { %144 = vmatpush3.msra.mxu0 %v41_v2  ;;  %p200_p10 = scmp.ne.s32.totalorder %s126_s1, %s199_s22  ;;  %p204_p11 = scmp.lt.s32.totalorder %s126_s1, %s126_s1 }
  0x20   :  { %145 = vmatprep.subr.mxu0 %v229_v0  ;;  %p205_p12 = scmp.lt.s32.totalorder %s203_s23, %s199_s22 }
  0x21   :  { %146 = vmatpush3.msra.mxu0 %v40_v3 }
  0x22   :  { %147 = vmatprep.subr.mxu0 %v229_v0  ;;  %p206_p13 = por %p205_p12, %p204_p11 }
  0x23   :  { %148 = vmatpush3.msra.mxu0 %v39_v4 }
  0x24   :  { %150 = vmatmul.mubr.msk.f32.vlgmr.msra.gmra.mxu0 %vm43_vm1, %v38_v5  ;;  %p207_p0 = pnand %p206_p13, %p200_p10 }
  0xe4   :  { %v113_v6 = vpop.f32.mrf.mxu0 }
  0xe5   :  { %118 = vst.msk [vmem:[#allocation7] sm:$0x1] %vm117_vm2, %v113_v6 }
  0xe6   :  { %v151_v7 = vpop.f32.mrf.mxu0 }
  0xe7   :  { %210 = shalt.err (!%p207_p0)
}
  0xe8   :  { %128 = dma.vmem_to_hbm [thread:$0]  %s126_s1, 16, %s258_s2, [#allocation4]  }
  0xe9   :  { %223 = dma.done.wait [#allocation4], 16  }
  0xea   :  { %224 = vsyncadd [#allocation4], 4294967280 }
  0xeb   :  { %132 = vsyncpa [#allocation3], 1 }
  0xec   :  { %133 = vsyncpa [#allocation6], 1 }
  0xed   :  { %134 = vsyncpa [#allocation4], 1 }

</bundles_post_ra>
